<compile_context>
chip_gen: v6e
topology: v6e:2x2x1
jax: 0.10.0
libtpu: 0.0.40
codegen_flags: <defaults>
</compile_context>

<pallas_src>
import jax
import jax.numpy as jnp
from jax.experimental import pallas as pl
from jax.experimental.pallas import tpu as pltpu


def _round_up(x, m):
    return ((x + m - 1) // m) * m


# ----------------------------------------------------------------------------
# Kernel 1: fused LM-head matmul + shifted-token cross entropy (compute_nll)
#           tiled over (rows, vocab) with online softmax
# ----------------------------------------------------------------------------
def _make_nll_kernel(tv, v_real, v_pad):
    needs_vmask = (v_pad != v_real)

    def kernel(h_ref, w_ref, lab_ref, out_ref, m_ref, l_ref, p_ref):
        # h_ref:   (tr, D)   hidden-state rows (native dtype, e.g. bf16)
        # w_ref:   (D, tv)   LM-head weight vocab tile (native dtype)
        # lab_ref: (tr, 1)   int32 shifted labels (-100 = ignore)
        # out_ref: (tr, 1)   per-row NLL, written only at the last vocab step
        # m/l/p_ref: (tr, 1) f32 online-softmax scratch (max / sum / picked)
        k = pl.program_id(1)

        @pl.when(k == 0)
        def _init():
            m_ref[...] = jnp.full(m_ref.shape, -1e30, jnp.float32)
            l_ref[...] = jnp.zeros(l_ref.shape, jnp.float32)
            p_ref[...] = jnp.zeros(p_ref.shape, jnp.float32)

        # MXU: native-dtype matmul with f32 accumulation (no upcast).
        logits = jnp.dot(h_ref[...], w_ref[...],
                         preferred_element_type=jnp.float32)  # (tr, tv) f32

        lab = lab_ref[...]                                     # (tr, 1) int32
        ids = k * tv + jax.lax.broadcasted_iota(jnp.int32, logits.shape, 1)
        if needs_vmask:  # mask padded vocab columns out of the softmax
            logits = jnp.where(ids < v_real, logits, -1e30)

        m_prev = m_ref[...]
        m_new = jnp.maximum(m_prev, jnp.max(logits, axis=-1, keepdims=True))
        alpha = jnp.exp(m_prev - m_new)
        l_ref[...] = l_ref[...] * alpha + jnp.sum(
            jnp.exp(logits - m_new), axis=-1, keepdims=True)
        # picked target logit via masked select (no full one-hot); labels that
        # fall outside this vocab tile (or are -100) contribute 0 here.
        p_ref[...] = p_ref[...] + jnp.sum(
            jnp.where(ids == lab, logits, 0.0), axis=-1, keepdims=True)
        m_ref[...] = m_new

        @pl.when(k == pl.num_programs(1) - 1)
        def _finalize():
            valid = (lab != -100).astype(jnp.float32)
            lse = m_ref[...] + jnp.log(l_ref[...])
            out_ref[...] = (lse - p_ref[...]) * valid

    return kernel


def compute_nll_pallas(hidden, w_head, shifted_labels, *,
                       row_tile=256, vocab_tile=1024, vmem_limit_bytes=None):
    """Per-row NLL of the fused LM-head + cross entropy.

    hidden:         (B, T, D)   native (e.g. bf16) hidden states
    w_head:         (D, V)      LM-head weight
    shifted_labels: (B, T)      int32, already shifted; -100 = ignore
    returns:        (B*T,) f32  per-row NLL (0 at ignored rows)
    """
    B, T, D = hidden.shape
    Dw, V = w_head.shape
    assert Dw == D
    R = B * T

    tr = min(_round_up(row_tile, 8), _round_up(R, 8))
    tv = min(_round_up(vocab_tile, 128), _round_up(V, 128))
    R_pad = _round_up(R, tr)
    V_pad = _round_up(V, tv)
    D_pad = _round_up(D, 128)

    h2 = hidden.reshape(R, D)
    lab2 = shifted_labels.reshape(R, 1).astype(jnp.int32)
    w = w_head
    if D_pad != D:
        h2 = jnp.pad(h2, ((0, 0), (0, D_pad - D)))
        w = jnp.pad(w, ((0, D_pad - D), (0, 0)))
    if R_pad != R:
        h2 = jnp.pad(h2, ((0, R_pad - R), (0, 0)))
        lab2 = jnp.pad(lab2, ((0, R_pad - R), (0, 0)), constant_values=-100)
    if V_pad != V:
        w = jnp.pad(w, ((0, 0), (0, V_pad - V)))

    if vmem_limit_bytes is None:
        # double-buffered h & w tiles + f32 logits temporaries + slack
        est = (2 * (tr * D_pad * h2.dtype.itemsize + D_pad * tv * w.dtype.itemsize)
               + 2 * tr * tv * 4 + (2 << 20))
        vmem_limit_bytes = max(est, 32 * 1024 * 1024)

    grid = (R_pad // tr, V_pad // tv)
    kernel = _make_nll_kernel(tv=tv, v_real=V, v_pad=V_pad)

    cost = pl.CostEstimate(
        flops=2 * R_pad * D_pad * V_pad,
        transcendentals=R_pad * V_pad,
        bytes_accessed=(h2.size * h2.dtype.itemsize
                        + w.size * w.dtype.itemsize
                        + lab2.size * lab2.dtype.itemsize
                        + R_pad * 4),
    )

    out = pl.pallas_call(
        kernel,
        out_shape=jax.ShapeDtypeStruct((R_pad, 1), jnp.float32),
        grid_spec=pltpu.PrefetchScalarGridSpec(
            num_scalar_prefetch=0,
            grid=grid,
            in_specs=[
                pl.BlockSpec((tr, D_pad), lambda i, k: (i, 0)),
                pl.BlockSpec((D_pad, tv), lambda i, k: (0, k)),
                pl.BlockSpec((tr, 1), lambda i, k: (i, 0)),
            ],
            out_specs=pl.BlockSpec((tr, 1), lambda i, k: (i, 0)),
            scratch_shapes=[
                pltpu.VMEM((tr, 1), jnp.float32),   # running max
                pltpu.VMEM((tr, 1), jnp.float32),   # running sum
                pltpu.VMEM((tr, 1), jnp.float32),   # picked logit
            ],
        ),
        compiler_params=pltpu.CompilerParams(
            dimension_semantics=("parallel", "arbitrary"),
            vmem_limit_bytes=vmem_limit_bytes,
        ),
        cost_estimate=cost,
    )(h2, w, lab2)
    return out[:R, 0]


# ----------------------------------------------------------------------------
# Kernel 2: biencoder InfoNCE (retriever loss), sim = q @ d^T, diagonal targets
# ----------------------------------------------------------------------------
def _make_infonce_kernel(b_real, b_pad):
    needs_mask = (b_pad != b_real)

    def kernel(q_ref, d_ref, out_ref):
        sim = jax.lax.dot_general(
            q_ref[...], d_ref[...],
            dimension_numbers=(((1,), (1,)), ((), ())),
            preferred_element_type=jnp.float32)             # (b_pad, b_pad)
        row = jax.lax.broadcasted_iota(jnp.int32, sim.shape, 0)
        col = jax.lax.broadcasted_iota(jnp.int32, sim.shape, 1)
        if needs_mask:  # padded doc columns must not enter the softmax
            sim = jnp.where(col < b_real, sim, -1e30)
        m = jnp.max(sim, axis=-1, keepdims=True)
        lse = m + jnp.log(jnp.sum(jnp.exp(sim - m), axis=-1, keepdims=True))
        picked = jnp.sum(jnp.where(row == col, sim, 0.0), axis=-1, keepdims=True)
        nll = lse - picked                                   # (b_pad, 1)
        if needs_mask:  # padded query rows contribute nothing
            nll = jnp.where(row[:, :1] < b_real, nll, 0.0)
        out_ref[...] = jnp.sum(nll, axis=0, keepdims=True) / b_real

    return kernel


def infonce_pallas(q_emb, d_emb):
    B, H = q_emb.shape
    B_pad = _round_up(B, 8)
    H_pad = _round_up(H, 128)
    q, d = q_emb, d_emb
    if B_pad != B or H_pad != H:
        q = jnp.pad(q, ((0, B_pad - B), (0, H_pad - H)))
        d = jnp.pad(d, ((0, B_pad - B), (0, H_pad - H)))
    out = pl.pallas_call(
        _make_infonce_kernel(B, B_pad),
        out_shape=jax.ShapeDtypeStruct((1, 1), jnp.float32),
        grid=(1,),
        in_specs=[
            pl.BlockSpec((B_pad, H_pad), lambda i: (0, 0)),
            pl.BlockSpec((B_pad, H_pad), lambda i: (0, 0)),
        ],
        out_specs=pl.BlockSpec((1, 1), lambda i: (0, 0)),
    )(q, d)
    return out[0, 0]


# ----------------------------------------------------------------------------
# RAG forward (glue in plain JAX)
# ----------------------------------------------------------------------------
def rag_forward(w_head, hidden, input_ids, source_len, q_emb, d_emb, *,
                row_tile=256, vocab_tile=1024):
    # TODO(synk): tokenizer, prompt templating (apply_docs_prompt /
    #             apply_inst_prompt) and candidate re-sorting by the reranker
    #             are host-side string ops with no Pallas equivalent; the
    #             frozen HF LLM body is represented by `hidden` + `w_head`.
    loss_r = infonce_pallas(q_emb, d_emb)

    # labels = input_ids.clone(); labels[i, :source_len[i]-1] = -100
    B, T = input_ids.shape
    pos = jnp.arange(T, dtype=jnp.int32)[None, :]
    src = source_len[:, None].astype(jnp.int32)
    labels = jnp.where(pos < (src - 1), -100, input_ids.astype(jnp.int32))
    # pre-shift labels (shift_labels = labels[..., 1:]); pad last slot with -100
    shifted = jnp.concatenate(
        [labels[:, 1:], jnp.full((B, 1), -100, jnp.int32)], axis=1)  # (B, T)

    nll_rows = compute_nll_pallas(hidden, w_head, shifted,
                                  row_tile=row_tile, vocab_tile=vocab_tile)
    # torch: CrossEntropy(reduction='none') then .view(B,-1).mean(-1) over T-1 slots
    loss_g = nll_rows.reshape(B, T).sum(axis=-1) / (T - 1)
    loss = loss_r + jnp.mean(loss_g)
    return {"loss": loss, "loss_r": loss_r, "loss_g": loss_g, "loss_kl": None}


# ----------------------------------------------------------------------------
# Pure-JAX reference (for correctness check of the kernels)
# ----------------------------------------------------------------------------
def _reference(w_head, hidden, input_ids, source_len, q_emb, d_emb):
    B, T = input_ids.shape
    logits = jax.lax.dot_general(
        hidden, w_head, dimension_numbers=(((2,), (0,)), ((), ())),
        preferred_element_type=jnp.float32)
    pos = jnp.arange(T)[None, :]
    labels = jnp.where(pos < (source_len[:, None] - 1), -100, input_ids)
    shift_logits = logits[:, :-1, :]
    shift_labels = labels[:, 1:]
    logp = jax.nn.log_softmax(shift_logits, axis=-1)
    tok = jnp.take_along_axis(
        logp, jnp.clip(shift_labels, 0)[:, :, None], axis=-1)[:, :, 0]
    valid = (shift_labels != -100).astype(jnp.float32)
    loss_g = jnp.sum(-tok * valid, axis=-1) / (T - 1)

    sim = jax.lax.dot_general(
        q_emb, d_emb, dimension_numbers=(((1,), (1,)), ((), ())),
        preferred_element_type=jnp.float32)
    logp_r = jax.nn.log_softmax(sim, axis=-1)
    loss_r = -jnp.mean(jnp.diagonal(logp_r))
    return loss_r, loss_g, loss_r + jnp.mean(loss_g)


if __name__ == "__main__":
    key = jax.random.PRNGKey(0)
    B, T, D, V, H = 2, 8, 128, 512, 128

    k1, k2, k3, k4, k5 = jax.random.split(key, 5)
    w_head = (jax.random.normal(k1, (D, V), jnp.float32) * 0.05).astype(jnp.bfloat16)
    hidden = jax.random.normal(k2, (B, T, D), jnp.float32).astype(jnp.bfloat16)
    input_ids = jax.random.randint(k3, (B, T), 0, V, jnp.int32)  # prompt+target ids
    source_len = jnp.array([3, 4], jnp.int32)                    # prompt lengths
    q_emb = jax.random.normal(k4, (B, H), jnp.float32).astype(jnp.bfloat16)
    d_emb = jax.random.normal(k5, (B, H), jnp.float32).astype(jnp.bfloat16)

    # small tiles so the (rows, vocab) grid + online softmax path is exercised
    out = rag_forward(w_head, hidden, input_ids, source_len, q_emb, d_emb,
                      row_tile=8, vocab_tile=256)
    jax.block_until_ready(out["loss"])

    ref_r, ref_g, ref_loss = _reference(
        w_head, hidden, input_ids, source_len, q_emb, d_emb)
    assert jnp.allclose(out["loss_r"], ref_r, rtol=1e-3, atol=1e-3), (out["loss_r"], ref_r)
    assert jnp.allclose(out["loss_g"], ref_g, rtol=1e-3, atol=1e-3), (out["loss_g"], ref_g)
    assert jnp.allclose(out["loss"], ref_loss, rtol=1e-3, atol=1e-3), (out["loss"], ref_loss)

    print("KERNEL_OK")
</pallas_src>

<mosaic_0001>
module attributes {stable_mosaic.version = 11 : i64} {
  func.func @kernel(%arg0: i32, %arg1: memref<8x128xbf16, #tpu.memory_space<vmem>>, %arg2: memref<8x128xbf16, #tpu.memory_space<vmem>>, %arg3: memref<1x1xf32, #tpu.memory_space<vmem>>) attributes {dimension_semantics = [#tpu.dimension_semantics<arbitrary>], iteration_bounds = array<i64: 1>, scalar_prefetch = 0 : i64, scratch_operands = 0 : i64, tpu.core_type = #tpu.core_type<tc>, window_params = [{pipeline_mode = #tpu.pipeline_mode<synchronous>, transform_indices = @transform_0, window_bounds = array<i64: 8, 128>}, {pipeline_mode = #tpu.pipeline_mode<synchronous>, transform_indices = @transform_1, window_bounds = array<i64: 8, 128>}, {pipeline_mode = #tpu.pipeline_mode<synchronous>, transform_indices = @transform_2, window_bounds = array<i64: 1, 1>}]} {
    %c0 = arith.constant 0 : index
    %c0_0 = arith.constant 0 : index
    %0 = vector.load %arg1[%c0, %c0_0] : memref<8x128xbf16, #tpu.memory_space<vmem>>, vector<8x128xbf16>
    %c0_1 = arith.constant 0 : index
    %c0_2 = arith.constant 0 : index
    %1 = vector.load %arg2[%c0_1, %c0_2] : memref<8x128xbf16, #tpu.memory_space<vmem>>, vector<8x128xbf16>
    %cst = arith.constant dense<0.000000e+00> : vector<8x8xf32>
    %2 = tpu.matmul %0, %1, %cst {dimension_numbers = #tpu.dot_dimension_numbers<[1], [1], [0], [0], [0, 0, 1, 0], [], []>} : vector<8x128xbf16>, vector<8x128xbf16>, vector<8x8xf32> -> vector<8x8xf32>
    %3 = tpu.iota {dimensions = array<i32: 0>} : vector<8x8xi32>
    %4 = tpu.iota {dimensions = array<i32: 1>} : vector<8x8xi32>
    %c2_i32 = arith.constant 2 : i32
    %5 = vector.broadcast %c2_i32 : i32 to vector<8x8xi32>
    %6 = arith.cmpi slt, %4, %5 : vector<8x8xi32>
    %cst_3 = arith.constant -1.000000e+30 : f32
    %7 = vector.broadcast %cst_3 : f32 to vector<8x8xf32>
    %8 = arith.select %6, %2, %7 : vector<8x8xi1>, vector<8x8xf32>
    %cst_4 = arith.constant dense<0xFF800000> : vector<8xf32>
    %9 = vector.multi_reduction <maximumf>, %8, %cst_4 [1] : vector<8x8xf32> to vector<8xf32>
    %10 = vector.shape_cast %9 : vector<8xf32> to vector<8x1xf32>
    %11 = vector.broadcast %10 : vector<8x1xf32> to vector<8x8xf32>
    %12 = arith.subf %8, %11 : vector<8x8xf32>
    %13 = math.exp %12 : vector<8x8xf32>
    %cst_5 = arith.constant dense<0.000000e+00> : vector<8xf32>
    %14 = vector.multi_reduction <add>, %13, %cst_5 [1] : vector<8x8xf32> to vector<8xf32>
    %15 = vector.shape_cast %14 : vector<8xf32> to vector<8x1xf32>
    %16 = math.log %15 : vector<8x1xf32>
    %17 = arith.addf %10, %16 : vector<8x1xf32>
    %18 = arith.cmpi eq, %3, %4 : vector<8x8xi32>
    %cst_6 = arith.constant 0.000000e+00 : f32
    %19 = vector.broadcast %cst_6 : f32 to vector<8x8xf32>
    %20 = arith.select %18, %8, %19 : vector<8x8xi1>, vector<8x8xf32>
    %cst_7 = arith.constant dense<0.000000e+00> : vector<8xf32>
    %21 = vector.multi_reduction <add>, %20, %cst_7 [1] : vector<8x8xf32> to vector<8xf32>
    %22 = vector.shape_cast %21 : vector<8xf32> to vector<8x1xf32>
    %23 = arith.subf %17, %22 : vector<8x1xf32>
    %24 = vector.extract_strided_slice %3 {offsets = [0, 0], sizes = [8, 1], strides = [1, 1]} : vector<8x8xi32> to vector<8x1xi32>
    %c2_i32_8 = arith.constant 2 : i32
    %25 = vector.broadcast %c2_i32_8 : i32 to vector<8x1xi32>
    %26 = arith.cmpi slt, %24, %25 : vector<8x1xi32>
    %cst_9 = arith.constant 0.000000e+00 : f32
    %27 = vector.broadcast %cst_9 : f32 to vector<8x1xf32>
    %28 = arith.select %26, %23, %27 : vector<8x1xi1>, vector<8x1xf32>
    %cst_10 = arith.constant dense<0.000000e+00> : vector<1xf32>
    %29 = vector.multi_reduction <add>, %28, %cst_10 [0] : vector<8x1xf32> to vector<1xf32>
    %30 = vector.shape_cast %29 : vector<1xf32> to vector<1x1xf32>
    %cst_11 = arith.constant 2.000000e+00 : f32
    %31 = vector.broadcast %cst_11 : f32 to vector<1x1xf32>
    %32 = arith.divf %30, %31 : vector<1x1xf32>
    %c0_12 = arith.constant 0 : index
    %c0_13 = arith.constant 0 : index
    %33 = vector.load %arg3[%c0_12, %c0_13] : memref<1x1xf32, #tpu.memory_space<vmem>>, vector<1x1xf32>
    tpu.vector_store %arg3[%c0_12, %c0_13], %32 {strides = array<i32>} : memref<1x1xf32, #tpu.memory_space<vmem>>, vector<1x1xf32>,
    return
  }
  func.func @transform_0(%arg0: i32) -> (i32, i32) {
    %c0_i32 = arith.constant 0 : i32
    %c0_i32_0 = arith.constant 0 : i32
    %c0_i32_1 = arith.constant 0 : i32
    return %c0_i32, %c0_i32_0 : i32, i32
  }
  func.func @transform_1(%arg0: i32) -> (i32, i32) {
    %c0_i32 = arith.constant 0 : i32
    %c0_i32_0 = arith.constant 0 : i32
    %c0_i32_1 = arith.constant 0 : i32
    return %c0_i32, %c0_i32_0 : i32, i32
  }
  func.func @transform_2(%arg0: i32) -> (i32, i32) {
    %c0_i32 = arith.constant 0 : i32
    %c0_i32_0 = arith.constant 0 : i32
    %c0_i32_1 = arith.constant 0 : i32
    return %c0_i32, %c0_i32_0 : i32, i32
  }
}

</mosaic_0001>

<bundles_post_ra>
// kernel: tpu_custom_call.1
= control target key start
LH: loop header
LB: loop body
LE: loop exit
PB: predicated region body
PF: predicated region fallthrough
CT: control target
= control target key end

     0   :  { %7 = vsyncpa [#allocation3], 0  ;;  %s247_s0 = inlined_call_operand.hbm [shape: bf16[8,128], index: 0, kind: input, shape index: {}]   ;;  %s248_s1 = inlined_call_operand.hbm [shape: bf16[8,128], index: 1, kind: input, shape index: {}]   ;;  %s249_s2 = inlined_call_operand.hbm [shape: f32[1,1], index: 2, kind: output, shape index: {}]  }
   0x1   :  { %8 = vsyncpa [#allocation6], 0 }
   0x2   :  { %9 = vsyncpa [#allocation4], 0  ;;  %s215_s9 = smov [#allocation2]   ;;  %s216_s11 = smov [#allocation5]  }
   0x3   :  { %s16_s10 = sshll.u32 %s215_s9, 4  ;;  %s26_s12 = sshll.u32 %s216_s11, 4  ;;  %s17_s10 = int_to_ptr.vmem [resolvable:$true] %s16_s10  ;;  %s27_s12 = int_to_ptr.vmem [resolvable:$true] %s26_s12 }
   0x4   :  { %s157_s13 = scalar_lea.vmem %s17_s10, 64  ;;  %p162_p1 = scmp.lt.s32.totalorder %s17_s10, %s17_s10 }
   0x5   :  { %p158_p0 = scmp.ne.s32.totalorder %s17_s10, %s157_s13  ;;  %p163_p2 = scmp.lt.s32.totalorder %s157_s13, %s157_s13 }
   0x7   :  { %p164_p3 = por %p163_p2, %p162_p1 }
   0x9   :  { %p165_p4 = pnand %p164_p3, %p158_p0 }
   0xb   :  { %168 = shalt.err (!%p165_p4)
}
   0xc   :  { %19 = dma.hbm_to_vmem [thread:$0]  %s247_s0, 64, %s17_s10, [#allocation3]  }
   0xd   :  { %s177_s16 = scalar_lea.vmem %s27_s12, 64  ;;  %p182_p6 = scmp.lt.s32.totalorder %s27_s12, %s27_s12 }
   0xe   :  { %p178_p5 = scmp.ne.s32.totalorder %s27_s12, %s177_s16  ;;  %p183_p7 = scmp.lt.s32.totalorder %s177_s16, %s177_s16 }
  0x10   :  { %p184_p8 = por %p183_p7, %p182_p6 }
  0x12   :  { %p185_p9 = pnand %p184_p8, %p178_p5 }
  0x14   :  { %188 = shalt.err (!%p185_p9)
}
  0x15   :  { %29 = dma.hbm_to_vmem [thread:$0]  %s248_s1, 64, %s27_s12, [#allocation6]  }
  0x16   :  { %209 = dma.done.wait [#allocation3], 64  }
  0x17   :  { %210 = vsyncadd [#allocation3], 4294967232 }
  0x18   :  { %211 = dma.done.wait [#allocation6], 64  }
  0x19   :  { %212 = vsyncadd [#allocation6], 4294967232  ;;  %v217_v0 = vmov 0.0   ;;  %vm218_vm0 = vmmov 0   ;;  %v38_v1 = vld [vmem:[#allocation5] sm:$0xf]  ;;  %v79_v3 = vlaneseq }
  0x1a   :  { %134 = vmatprep.subr.bf16.mxu0 %v217_v0  ;;  %136 = vmatprep.mubr.msk.bf16.mxu0 %vm218_vm0, %v217_v0  ;;  %v37_v2 = vld [vmem:[#allocation2] sm:$0xf]  ;;  %vm85_vm2 = vcmask 64512   ;;  %s219_s0 = smov [#allocation7]   ;;  %vm114_vm5 = vcmask 0  }
  0x1b   :  { %135 = vmatpush3.bf16.xpose.msra.mxu0 %v38_v1  ;;  %v82_v4 = vand.u32 127, %v79_v3  ;;  %v80_v5 = vshrl.u32 %v79_v3, 7  ;;  %s122_s1 = sshll.u32 %s219_s0, 4  ;;  %s123_s1 = int_to_ptr.vmem [resolvable:$true] %s122_s1 }
  0x1c   :  { %s189_s19 = scalar_lea.vmem %s123_s1, 16  ;;  %s193_s20 = scalar_lea.vmem %s123_s1, 32 }
  0x1d   :  { %vm83_vm1 = vcmp.lt.s32.totalorder %v82_v4, 2  ;;  %vm98_vm3 = vcmp.eq.s32.totalorder %v80_v5, %v82_v4  ;;  %vm104_vm4 = vcmp.lt.s32.totalorder %v80_v5, 2  ;;  %p190_p10 = scmp.ne.s32.totalorder %s123_s1, %s189_s19  ;;  %p194_p11 = scmp.lt.s32.totalorder %s123_s1, %s123_s1 }
  0x1e   :  { %p195_p12 = scmp.lt.s32.totalorder %s193_s20, %s189_s19 }
  0x20   :  { %p196_p13 = por %p195_p12, %p194_p11 }
  0x22   :  { %137 = vmatmul.mubr.bf16.vlgmr.msra.gmra.mxu0 %v37_v2  ;;  %p197_p0 = pnand %p196_p13, %p190_p10 }
  0xe2   :  { %v73_v6 = vpop.f32.mrf.mxu0 }
  0xe3   :  { %v84_v7 = vsel %vm83_vm1, %v73_v6, -1e+30 }
  0xe4   :  { %v138_v8 = vpop.f32.mrf.mxu0  ;;  %v86_v9 = vsel %vm85_vm2, %v84_v7, -inf  ;;  %v99_v10 = vsel %vm98_vm3, %v84_v7, 0.0 }
  0xe5   :  { %87 = vmax.xlane.f32.xlu0 %v86_v9  ;;  %v100_v11 = vsel %vm85_vm2, %v99_v10, 0.0 }
  0xe6   :  { %101 = vadd.xlane.f32.xlu1 %v100_v11  ;;  %v76_v12 = vpop.f32.mrf.mxu0 }
  0xe8   :  { %v139_v13 = vpop.f32.mrf.mxu0 }
 0x16e   :  { %v88_v14 = vpop.xlane.xlu0 %87 }
 0x16f   :  { %v89_v15 = vsub.f32 %v84_v7, %v88_v14  ;;  %v102_v23 = vpop.xlane.xlu1 %101 }
 0x171   :  { %v90_v16 = vmul.f32 1.442695, %v89_v15 }
 0x173   :  { %145 = vpow2.f32 %v90_v16 }
 0x180   :  { %v146_v17 = vpop.eup %145 }
 0x181   :  { %v92_v18 = vsel %vm85_vm2, %v146_v17, 0.0 }
 0x182   :  { %93 = vadd.xlane.f32.xlu0 %v92_v18 }
 0x20b   :  { %v94_v19 = vpop.xlane.xlu0 %93 }
 0x20c   :  { %147 = vlog2.f32 %v94_v19 }
 0x219   :  { %v148_v20 = vpop.eup %147 }
 0x21a   :  { %v96_v21 = vmul.f32 0.6931472, %v148_v20 }
 0x21c   :  { %v97_v22 = vadd.f32 %v96_v21, %v88_v14 }
 0x21e   :  { %v103_v24 = vsub.f32 %v97_v22, %v102_v23 }
 0x220   :  { %v105_v25 = vsel %vm104_vm4, %v103_v24, 0.0 }
 0x221   :  { %v106_v26 = vrot.slane %v105_v25, 4 }
 0x223   :  { %v107_v27 = vadd.f32 %v106_v26, %v105_v25 }
 0x225   :  { %v108_v28 = vrot.slane %v107_v27, 2 }
 0x227   :  { %v109_v29 = vadd.f32 %v108_v28, %v107_v27 }
 0x229   :  { %v110_v30 = vrot.slane %v109_v29, 1 }
 0x22b   :  { %v111_v31 = vadd.f32 %v110_v30, %v109_v29 }
 0x22d   :  { %v113_v32 = vmul.f32 0.5, %v111_v31 }
 0x22f   :  { %115 = vst.msk [vmem:[#allocation7] sm:$0x1] %vm114_vm5, %v113_v32 }
 0x230   :  { %200 = shalt.err (!%p197_p0)
}
 0x231   :  { %125 = dma.vmem_to_hbm [thread:$0]  %s123_s1, 16, %s249_s2, [#allocation4]  }
 0x232   :  { %213 = dma.done.wait [#allocation4], 16  }
 0x233   :  { %214 = vsyncadd [#allocation4], 4294967280 }
 0x234   :  { %129 = vsyncpa [#allocation3], 1 }
 0x235   :  { %130 = vsyncpa [#allocation6], 1 }
 0x236   :  { %131 = vsyncpa [#allocation4], 1 }

</bundles_post_ra>
